<compile_context>
chip_gen: v7x
topology: tpu7x:2x2x1
jax: 0.10.0
libtpu: 0.0.40
codegen_flags: <defaults>
</compile_context>

<pallas_src>
import jax
import jax.numpy as jnp
import numpy as np
from jax import lax
from jax.experimental import pallas as pl
from jax.experimental.pallas import tpu as pltpu

# pipeline_mode / Buffered support is version-dependent; degrade gracefully.
_BUFFERED = getattr(pl, "Buffered", None)


# --------------------------------------------------------------------------
# pltpu.roll rotate-direction probe (robust to either rotate convention).
# --------------------------------------------------------------------------
_ROLL_SIGN_CACHE = None


def _roll_sign():
    """+1 if pltpu.roll matches np.roll (out[i] = x[i - shift]), else -1."""
    global _ROLL_SIGN_CACHE
    if _ROLL_SIGN_CACHE is None:
        def probe(x_ref, o_ref):
            o_ref[...] = pltpu.roll(x_ref[...], 1, 1)

        x = np.tile(np.arange(128, dtype=np.float32), (8, 1))
        out = np.asarray(
            pl.pallas_call(
                probe, out_shape=jax.ShapeDtypeStruct((8, 128), jnp.float32)
            )(jnp.asarray(x)))
        _ROLL_SIGN_CACHE = 1 if np.array_equal(out, np.roll(x, 1, axis=1)) else -1
    return _ROLL_SIGN_CACHE


# --------------------------------------------------------------------------
# Kernel
# --------------------------------------------------------------------------
def _make_kernel(W, HWp, P1p, roll_sign):
    def shift_lanes(v, d):
        # out[:, i] = v[:, (i + d) mod HWp]  (halo masks zero wrapped/pad lanes)
        if d == 0:
            return v
        amt = (-roll_sign * d) % HWp
        return pltpu.roll(v, amt, 1)

    def conv7(src, w_ref, b_ref, mask_ref, stride):
        # 7-tap 1-D conv as 7 accumulating per-tap matmuls (no im2col stack).
        # Taps are rolled/masked in f32 and cast to bf16 right before the MXU.
        acc = None
        for k in range(7):
            d = k - 3
            t = shift_lanes(src, d * stride)
            if d != 0:
                t = t * mask_ref[k:k + 1, :]
            p = jnp.dot(w_ref[k], t.astype(jnp.bfloat16),
                        preferred_element_type=jnp.float32)
            acc = p if acc is None else acc + p
        return jnp.maximum(acc + b_ref[...], 0.0)

    def kernel(x_ref, w_in_ref, b_in_ref, w7b_ref, bb7b_ref, w7c_ref, bb7c_ref,
               wf1_ref, wf2_ref, bbf_ref, mw_ref, mh_ref, o_ref):
        x_bf = x_ref[0].astype(jnp.bfloat16)               # (C, HWp), single use

        # fused [branch-1x1 ; branch-7x7 stage 0] 1x1 convs + bias + ReLU
        y = jnp.dot(w_in_ref[...], x_bf, preferred_element_type=jnp.float32)
        y = jnp.maximum(y + b_in_ref[...], 0.0)            # (P1p+P70p, HWp)
        b1 = y[:P1p]                                       # 16-sublane aligned
        a = y[P1p:]

        # accumulate b1's share of the final 1x1 right away (frees b1's vregs)
        r = jnp.dot(wf1_ref[...], b1.astype(jnp.bfloat16),
                    preferred_element_type=jnp.float32)     # (C, HWp)

        # (1,7) conv along W, then (7,1) conv along H
        b = conv7(a, w7b_ref, bb7b_ref, mw_ref, 1)          # (P71p, HWp)
        c = conv7(b, w7c_ref, bb7c_ref, mh_ref, W)          # (P72p, HWp)

        # remaining part of ConcatBranches + final 1x1, bias + ReLU
        r = r + jnp.dot(wf2_ref[...], c.astype(jnp.bfloat16),
                        preferred_element_type=jnp.float32)
        r = jnp.maximum(r + bbf_ref[...], 0.0)

        # residual add + final ReLU; x re-read so its live range stays short
        o_ref[0] = jnp.maximum(x_ref[0] + r, 0.0)

    return kernel


# --------------------------------------------------------------------------
# Wrapper
# --------------------------------------------------------------------------
def inception_resnet_b(x_nchw, kparams):
    """x_nchw: (N, C, H, W) f32.  kparams: output of prepare_kernel_params."""
    N, C, H, W = x_nchw.shape
    HW = H * W
    HWp = int(kparams[-2].shape[1])      # mask_w: (7, HWp)
    P1p = int(kparams[6].shape[1])       # wf1_k: (C, P1p)

    x = x_nchw.reshape(N, C, HW).astype(jnp.float32)       # free view
    if HWp != HW:
        x = jnp.pad(x, ((0, 0), (0, 0), (0, HWp - HW)))    # lane-dense padding

    kernel = _make_kernel(W, HWp, P1p, _roll_sign())

    # advisory cost estimate + explicit VMEM budget
    mm_ws = (kparams[0], kparams[2], kparams[4], kparams[6], kparams[7])
    flops = int(2 * N * HWp * sum(int(np.prod(w.shape)) for w in mm_ws))
    weight_bytes = int(sum(int(a.size) * a.dtype.itemsize for a in kparams))
    bytes_accessed = int(2 * N * C * HWp * 4 + weight_bytes)
    io_block_bytes = C * HWp * 4
    # 2x in + 2x out blocks (pipelined) + weights (+ margin); keep <= 48 MiB so
    # the same budget also fits v7x's 64 MiB physical VMEM with headroom.
    vmem_limit = int(min(max(4 * io_block_bytes + 2 * weight_bytes + (4 << 20),
                             32 << 20), 48 << 20))

    def build(buffered):
        def wspec(a):
            nd = a.ndim
            imap = lambda n: (0,) * nd
            if buffered and _BUFFERED is not None:
                try:
                    # grid-invariant: single-buffer, DMA once before the grid
                    return pl.BlockSpec(a.shape, imap,
                                        pipeline_mode=_BUFFERED(1))
                except TypeError:
                    return pl.BlockSpec(a.shape, imap)
            return pl.BlockSpec(a.shape, imap)

        in_specs = [pl.BlockSpec((1, C, HWp), lambda n: (n, 0, 0))]
        in_specs += [wspec(a) for a in kparams]
        return pl.pallas_call(
            kernel,
            out_shape=jax.ShapeDtypeStruct((N, C, HWp), jnp.float32),
            grid=(N,),
            in_specs=in_specs,
            out_specs=pl.BlockSpec((1, C, HWp), lambda n: (n, 0, 0)),
            compiler_params=pltpu.CompilerParams(
                dimension_semantics=("parallel",),
                vmem_limit_bytes=vmem_limit),
            cost_estimate=pl.CostEstimate(
                flops=flops, transcendentals=0,
                bytes_accessed=bytes_accessed),
        )

    try:
        out = build(True)(x, *kparams)
    except Exception:
        # Fallback for jax versions whose TPU lowering rejects pipeline_mode.
        out = build(False)(x, *kparams)

    if HWp != HW:
        out = out[:, :, :HW]
    return out.reshape(N, C, H, W)


# --------------------------------------------------------------------------
# Host-side parameter preparation (fold BN scale, pad, bf16, masks)
# --------------------------------------------------------------------------
def _ceil_to(v, m):
    return -(-v // m) * m


def prepare_kernel_params(params, H, W):
    (w1, sb1, w7a, sb7a, w7b, sb7b, w7c, sb7c, wf, sbf) = params
    C, P1 = w1.shape
    P70 = w7a.shape[1]
    P71 = w7b.shape[2]
    P72 = w7c.shape[2]
    # bf16 packs 16 sublanes -> pad channel dims to multiples of 16.
    P1p, P70p, P71p, P72p = (_ceil_to(p, 16) for p in (P1, P70, P71, P72))
    HW = H * W
    HWp = _ceil_to(HW, 128)            # lane-dense spatial axis
    bf = jnp.bfloat16

    def pad_rows(a, n):
        return jnp.pad(a, ((0, n - a.shape[0]),) + ((0, 0),) * (a.ndim - 1))

    def pad_cols(a, n):
        return jnp.pad(a, ((0, 0), (0, n - a.shape[1])))

    # fused input 1x1 convs: rows = [branch-1x1 ; branch-7x7 stage 0]
    # NOTE: BN scale folded into bf16 weights; if accuracy regresses at
    # production channel counts, keep a per-channel f32 rescale in-kernel.
    w_in = jnp.concatenate(
        [pad_rows(w1.T * sb1[0][:, None], P1p),
         pad_rows(w7a.T * sb7a[0][:, None], P70p)], axis=0).astype(bf)
    b_in = jnp.concatenate(
        [pad_rows(sb1[1][:, None], P1p),
         pad_rows(sb7a[1][:, None], P70p)], axis=0).astype(jnp.float32)

    # (1,7) conv: one (P71p, P70p) weight slab per tap
    w7b_t = jnp.transpose(w7b * sb7b[0][None, None, :], (0, 2, 1))   # (7,P71,P70)
    w7b_k = jnp.pad(w7b_t, ((0, 0), (0, P71p - P71), (0, P70p - P70))).astype(bf)
    bb7b = pad_rows(sb7b[1][:, None], P71p).astype(jnp.float32)

    # (7,1) conv: one (P72p, P71p) weight slab per tap
    w7c_t = jnp.transpose(w7c * sb7c[0][None, None, :], (0, 2, 1))   # (7,P72,P71)
    w7c_k = jnp.pad(w7c_t, ((0, 0), (0, P72p - P72), (0, P71p - P71))).astype(bf)
    bb7c = pad_rows(sb7c[1][:, None], P72p).astype(jnp.float32)

    # final 1x1 over concat([b1, c]) — split along input channels
    wf_s = wf * sbf[0][None, :]                                      # (P1+P72, C)
    wf1_k = pad_cols(wf_s[:P1].T, P1p).astype(bf)                    # (C, P1p)
    wf2_k = pad_cols(wf_s[P1:].T, P72p).astype(bf)                   # (C, P72p)
    bbf = sbf[1][:, None].astype(jnp.float32)                        # (C, 1)

    # halo/validity masks on the padded lane axis: 1 where a tap stays inside
    # the image, 0 where the flattened lane-roll would wrap a row (W-taps),
    # the image (H-taps), or land in a pad lane.
    mask_w = np.zeros((7, HWp), np.float32)
    mask_h = np.zeros((7, HWp), np.float32)
    wi = np.arange(HW) % W
    hi = np.arange(HW) // W
    for k in range(7):
        d = k - 3
        mask_w[k, :HW] = ((wi + d >= 0) & (wi + d < W)).astype(np.float32)
        mask_h[k, :HW] = ((hi + d >= 0) & (hi + d < H)).astype(np.float32)

    return (w_in, b_in, w7b_k, bb7b, w7c_k, bb7c, wf1_k, wf2_k, bbf,
            jnp.asarray(mask_w), jnp.asarray(mask_h))


# --------------------------------------------------------------------------
# Logical parameter construction (conv weights + folded-BN scale/bias)
# --------------------------------------------------------------------------
def _folded_bn(key, cout):
    kg, kb, km, kv = jax.random.split(key, 4)
    gamma = jax.random.uniform(kg, (cout,), minval=0.5, maxval=1.5)
    beta = 0.1 * jax.random.normal(kb, (cout,))
    mean = 0.1 * jax.random.normal(km, (cout,))
    var = jax.random.uniform(kv, (cout,), minval=0.5, maxval=1.5)
    scale = gamma / jnp.sqrt(var + 1e-5)
    bias = beta - mean * scale
    return jnp.stack([scale, bias]).astype(jnp.float32)              # (2, cout)


def make_params(key, inp, planes_1x1, planes_7x7):
    p1 = planes_1x1
    p70, p71, p72 = planes_7x7
    ks = jax.random.split(key, 10)
    w1 = 0.1 * jax.random.normal(ks[0], (inp, p1), jnp.float32)       # (Cin, Cout)
    sb1 = _folded_bn(ks[1], p1)
    w7a = 0.1 * jax.random.normal(ks[2], (inp, p70), jnp.float32)
    sb7a = _folded_bn(ks[3], p70)
    w7b = 0.1 * jax.random.normal(ks[4], (7, p70, p71), jnp.float32)  # index = kw
    sb7b = _folded_bn(ks[5], p71)
    w7c = 0.1 * jax.random.normal(ks[6], (7, p71, p72), jnp.float32)  # index = kh
    sb7c = _folded_bn(ks[7], p72)
    wf = 0.1 * jax.random.normal(ks[8], (p1 + p72, inp), jnp.float32)
    sbf = _folded_bn(ks[9], inp)
    return (w1, sb1, w7a, sb7a, w7b, sb7b, w7c, sb7c, wf, sbf)


# --------------------------------------------------------------------------
# Pure-JAX reference (lax.conv, full f32)
# --------------------------------------------------------------------------
def reference(x_nchw, params):
    (w1, sb1, w7a, sb7a, w7b, sb7b, w7c, sb7c, wf, sbf) = params
    x = jnp.transpose(x_nchw, (0, 2, 3, 1))             # NHWC

    def conv(y, w_hwio, pad):
        return lax.conv_general_dilated(
            y, w_hwio, window_strides=(1, 1), padding=pad,
            dimension_numbers=('NHWC', 'HWIO', 'NHWC'),
            precision=lax.Precision.HIGHEST)

    def cba(y, sb):
        return jnp.maximum(y * sb[0] + sb[1], 0.0)

    b1 = cba(conv(x, w1.reshape(1, 1, *w1.shape), [(0, 0), (0, 0)]), sb1)
    a = cba(conv(x, w7a.reshape(1, 1, *w7a.shape), [(0, 0), (0, 0)]), sb7a)
    b = cba(conv(a, w7b[None, :, :, :], [(0, 0), (3, 3)]), sb7b)
    c = cba(conv(b, w7c[:, None, :, :], [(3, 3), (0, 0)]), sb7c)
    cat = jnp.concatenate([b1, c], axis=-1)
    r = cba(conv(cat, wf.reshape(1, 1, *wf.shape), [(0, 0), (0, 0)]), sbf)
    out = jnp.maximum(x + r, 0.0)
    return jnp.transpose(out, (0, 3, 1, 2))


if __name__ == "__main__":
    key = jax.random.PRNGKey(0)
    kx, kp = jax.random.split(key)

    inp, planes_1x1, planes_7x7 = 8, 8, [8, 12, 16]
    N, H, W = 2, 17, 17          # 17x17 exercises the lane-padding path (289->384)

    x = jax.random.normal(kx, (N, inp, H, W), jnp.float32)   # NCHW like PyTorch
    params = make_params(kp, inp, planes_1x1, planes_7x7)
    kparams = prepare_kernel_params(params, H, W)

    out = inception_resnet_b(x, kparams)
    out = jax.block_until_ready(out)

    ref = reference(x, params)
    # tolerance sized for bf16 matmul operands with f32 accumulation
    np.testing.assert_allclose(np.asarray(out), np.asarray(ref),
                               rtol=2e-2, atol=2e-2)
    print("KERNEL_OK")
</pallas_src>

<mosaic_0001>
module attributes {stable_mosaic.version = 11 : i64} {
  func.func @probe(%arg0: memref<8x128xf32, #tpu.memory_space<vmem>>, %arg1: memref<8x128xf32, #tpu.memory_space<vmem>>) attributes {dimension_semantics = [], scalar_prefetch = 0 : i64, scratch_operands = 0 : i64, tpu.core_type = #tpu.core_type<tc>} {
    %c0 = arith.constant 0 : index
    %c0_0 = arith.constant 0 : index
    %0 = vector.load %arg0[%c0, %c0_0] : memref<8x128xf32, #tpu.memory_space<vmem>>, vector<8x128xf32>
    %c1_i32 = arith.constant 1 : i32
    %1 = tpu.dynamic_rotate %0 by %c1_i32 dim 1 : vector<8x128xf32>, i32 -> vector<8x128xf32>
    %c0_1 = arith.constant 0 : index
    %c0_2 = arith.constant 0 : index
    %2 = vector.load %arg1[%c0_1, %c0_2] : memref<8x128xf32, #tpu.memory_space<vmem>>, vector<8x128xf32>
    tpu.vector_store %arg1[%c0_1, %c0_2], %1 {strides = array<i32>} : memref<8x128xf32, #tpu.memory_space<vmem>>, vector<8x128xf32>,
    return
  }
}

</mosaic_0001>

<bundles_post_ra>
// kernel: tpu_custom_call.1
= control target key start
LH: loop header
LB: loop body
LE: loop exit
PB: predicated region body
PF: predicated region fallthrough
CT: control target
= control target key end

     0   :  { %6 = vsyncpa [#allocation3], 0  ;;  %s128_s0 = inlined_call_operand.hbm [shape: f32[8,128], index: 0, kind: input, shape index: {}]   ;;  %s129_s1 = inlined_call_operand.hbm [shape: f32[8,128], index: 1, kind: output, shape index: {}]  }
   0x1   :  { %7 = vsyncpa [#allocation4], 0  ;;  %s91_s6 = smov [#allocation2]   ;;  %s43_s10 = scalar_lea.hbm %s128_s0, 128 }
   0x2   :  { %s14_s7 = sshll.u32 %s91_s6, 4  ;;  %p44_p0 = scmp.ne.s32.totalorder %s128_s0, %s43_s10  ;;  %s15_s7 = int_to_ptr.vmem [resolvable:$true] %s14_s7 }
   0x3   :  { %p47_p1 = scmp.lt.u32.totalorder %s43_s10, %s128_s0 }
   0x5   :  { %p49_p2 = pnand %p47_p1, %p44_p0 }
   0x7   :  { %52 = shalt.err (!%p49_p2)
}
   0x8   :  { %s53_s15 = scalar_lea.vmem %s15_s7, 128  ;;  %p58_p4 = scmp.lt.s32.totalorder %s15_s7, %s15_s7 }
   0x9   :  { %p54_p3 = scmp.ne.s32.totalorder %s15_s7, %s53_s15  ;;  %p59_p5 = scmp.lt.s32.totalorder %s53_s15, %s53_s15 }
   0xb   :  { %p60_p6 = por %p59_p5, %p58_p4 }
   0xd   :  { %p61_p7 = pnand %p60_p6, %p54_p3 }
   0xf   :  { %64 = shalt.err (!%p61_p7)
}
  0x10   :  { %17 = dma.hbm_to_vmem [thread:$0]  %s128_s0, 128, %s15_s7, [#allocation3]  }
  0x11   :  { %87 = dma.done.wait [#allocation3], 128  }
  0x12   :  { %88 = vsyncadd [#allocation3], 4294967168  ;;  %v21_v0 = vld [vmem:[#allocation2] sm:$0xff]  ;;  %s92_s18 = smov 1   ;;  %s93_s19 = smov [#allocation5]  }
  0x13   :  { %22 = vrot.lane.b32.xlu0 %v21_v0, %s92_s18  ;;  %s31_s20 = sshll.u32 %s93_s19, 4  ;;  %s32_s20 = int_to_ptr.vmem [resolvable:$true] %s31_s20 }
  0x14   :  { %s65_s21 = scalar_lea.vmem %s32_s20, 128  ;;  %p70_p9 = scmp.lt.s32.totalorder %s32_s20, %s32_s20 }
  0x15   :  { %p66_p8 = scmp.ne.s32.totalorder %s32_s20, %s65_s21  ;;  %p71_p10 = scmp.lt.s32.totalorder %s65_s21, %s65_s21 }
  0x17   :  { %p72_p11 = por %p71_p10, %p70_p9 }
  0x19   :  { %p73_p12 = pnand %p72_p11, %p66_p8 }
  0x85   :  { %v23_v1 = vpop.permute.xlu0 %22 }
  0x86   :  { %24 = vst [vmem:[#allocation5] sm:$0xff] %v23_v1 }
  0x87   :  { %76 = shalt.err (!%p73_p12)
}
  0x88   :  { %s77_s0 = scalar_lea.hbm %s129_s1, 128 }
  0x89   :  { %p78_p13 = scmp.ne.s32.totalorder %s129_s1, %s77_s0  ;;  %p81_p0 = scmp.lt.u32.totalorder %s77_s0, %s129_s1 }
  0x8b   :  { %p83_p1 = pnand %p81_p0, %p78_p13 }
  0x8d   :  { %86 = shalt.err (!%p83_p1)
}
  0x8e   :  { %34 = dma.vmem_to_hbm [thread:$0]  %s32_s20, 128, %s129_s1, [#allocation4]  }
  0x8f   :  { %89 = dma.done.wait [#allocation4], 128  }
  0x90   :  { %90 = vsyncadd [#allocation4], 4294967168 }
  0x91   :  { %38 = vsyncpa [#allocation3], 1 }
  0x92   :  { %39 = vsyncpa [#allocation4], 1 }

</bundles_post_ra>
